<compile_context>
chip_gen: v7x
topology: tpu7x:2x2x1
jax: 0.10.0
libtpu: 0.0.40
codegen_flags: <defaults>
</compile_context>

<pallas_src>
import numpy as np
import jax
import jax.numpy as jnp
from jax.experimental import pallas as pl
from jax.experimental.pallas import tpu as pltpu


def _cdiv(a: int, b: int) -> int:
    return -(-a // b)


def get_sinusoid_encoding(num_tokens: int, token_len: int) -> jnp.ndarray:
    """Sinusoidal position encoding table, shape (1, num_tokens, token_len)."""
    pos = np.arange(num_tokens, dtype=np.float64)[:, None]          # (N, 1)
    j = np.arange(token_len, dtype=np.float64)[None, :]             # (1, D)
    angle = pos / np.power(10000.0, 2.0 * np.floor(j / 2.0) / token_len)
    table = np.empty_like(angle)
    table[:, 0::2] = np.sin(angle[:, 0::2])
    table[:, 1::2] = np.cos(angle[:, 1::2])
    return jnp.asarray(table[None, ...], dtype=jnp.float32)         # (1, N, D)


# ----------------------------------------------------------------------------
# Kernel
# ----------------------------------------------------------------------------
def _add_pos_kernel(x_ref, pos_ref, o_ref):
    # x_ref: (TB, TC) batch-rows tile; pos_ref: (1, TC) shared f32 pos tile.
    # Compute in f32 (single rounding on store, matches the PyTorch reference),
    # jnp broadcasting expands pos over the TB sublane rows on the VPU.
    o_ref[...] = (x_ref[...].astype(jnp.float32) + pos_ref[...]).astype(o_ref.dtype)


# ----------------------------------------------------------------------------
# Tiling policy
# ----------------------------------------------------------------------------
def _tiling_policy():
    """(target block bytes, min grid steps) per TPU generation."""
    try:
        kind = jax.devices()[0].device_kind.lower()
    except Exception:  # pragma: no cover - defensive
        kind = ""
    if "v7" in kind or "7x" in kind:
        # 3.2 TB/s HBM: larger tiles amortize the ~0.35us/step overhead,
        # and two TensorCores need >= a handful of parallel grid steps.
        return 8 * 1024 * 1024, 8
    if "v6" in kind:
        return 4 * 1024 * 1024, 2    # ~86% of HBM roofline already
    # v5e (16 MiB scoped-VMEM default) and unknown chips: conservative.
    return 3 * 1024 * 1024, 2


def _choose_block(B: int, F: int, itemsize: int,
                  target_bytes: int, min_steps: int):
    """Pick (TB, TC) for a lane-dense (B, F) elementwise add.

    TC is a multiple of 128 (or the full extent F); TB is a multiple of the
    packed sublane count for the dtype (8 f32 / 16 bf16 / 32 int8) or the
    full extent B. Blocks need not divide the array (cdiv grid, masked edge).
    Biased toward a wide lane (TC) dimension for long contiguous HBM runs,
    then shrunk if needed so the grid has at least `min_steps` steps.
    """
    lane = 128
    sub = max(8, 32 // itemsize)
    rows_min = B if B < sub else sub
    tb_min = B if B < sub else sub
    tc_min = F if F < lane else lane

    # --- lane (last-dim) tile: as wide as the budget allows -----------------
    if F <= lane:
        tc = F                                            # full extent
    elif rows_min * F * itemsize <= target_bytes:
        tc = F                                            # whole row fits
    else:
        cols_budget = target_bytes // max(1, rows_min * itemsize)
        tc = max(lane, min(F // lane, cols_budget // lane) * lane)

    # --- sublane (row) tile --------------------------------------------------
    if B <= sub:
        tb = B                                            # full extent
    else:
        rows_budget = target_bytes // max(1, tc * itemsize)
        tb = max(sub, min(B // sub, rows_budget // sub) * sub)

    # --- guarantee enough grid steps (megacore sharding + pipeline overlap) --
    while _cdiv(B, tb) * _cdiv(F, tc) < min_steps:
        if tb > tb_min:
            tb = max(tb_min, (tb // (2 * sub)) * sub or tb_min)
        elif tc > tc_min:
            tc = max(tc_min, (tc // (2 * lane)) * lane or tc_min)
        else:
            break
    return tb, tc


# ----------------------------------------------------------------------------
# Wrapper
# ----------------------------------------------------------------------------
def _positional_add_2d(x2: jnp.ndarray, pos2: jnp.ndarray,
                       *, donate_input: bool = False) -> jnp.ndarray:
    """x2: (B, F) any float dtype; pos2: (1, F) float32. Returns x2 + pos2."""
    B, F = x2.shape
    assert pos2.shape == (1, F)

    itemsize = jnp.dtype(x2.dtype).itemsize
    target_bytes, min_steps = _tiling_policy()
    TB, TC = _choose_block(B, F, itemsize, target_bytes, min_steps)
    nB, nF = _cdiv(B, TB), _cdiv(F, TC)

    # Double-buffered x + out blocks, plus the tiny f32 pos block, plus slack.
    vmem_needed = 4 * TB * TC * itemsize + 4 * TC * 4
    vmem_limit = int(min(48 * 1024 * 1024,
                         max(vmem_needed + (4 << 20), 16 * 1024 * 1024)))

    kwargs = {}
    if donate_input:
        # Only valid when the caller guarantees x2 is dead after this call
        # (e.g. jit donate_argnums); otherwise XLA inserts a defensive copy.
        kwargs["input_output_aliases"] = {0: 0}

    out = pl.pallas_call(
        _add_pos_kernel,
        out_shape=jax.ShapeDtypeStruct((B, F), x2.dtype),
        grid_spec=pltpu.PrefetchScalarGridSpec(
            num_scalar_prefetch=0,
            # Batch innermost: pos block index (0, j) is constant across the
            # inner loop, so its tile stays resident (no re-DMA per step).
            grid=(nF, nB),
            in_specs=[
                pl.BlockSpec((TB, TC), lambda j, i: (i, j)),   # x tile
                pl.BlockSpec((1, TC), lambda j, i: (0, j)),    # shared pos tile
            ],
            out_specs=pl.BlockSpec((TB, TC), lambda j, i: (i, j)),
        ),
        compiler_params=pltpu.CompilerParams(
            dimension_semantics=("parallel", "parallel"),
            vmem_limit_bytes=vmem_limit,
        ),
        **kwargs,
    )(x2, pos2)
    return out


def positional_embedding_forward(x: jnp.ndarray, pos_embedding: jnp.ndarray,
                                 *, donate_input: bool = False) -> jnp.ndarray:
    """x: (B, S, D), pos_embedding: (1, S, D)  ->  (B, S, D)"""
    B, S, D = x.shape
    assert pos_embedding.shape == (1, S, D)
    F = S * D
    pos2 = pos_embedding.reshape(1, F).astype(jnp.float32)
    out2 = _positional_add_2d(x.reshape(B, F), pos2, donate_input=donate_input)
    return out2.reshape(B, S, D)


class PositionalEmbedding:
    """JAX/Pallas port of the PyTorch PositionalEmbedding module."""

    def __init__(self, seq_len: int, emb_dim: int, num_channels: int, relative: bool = False):
        self.num_channels = num_channels
        self.seq_len = seq_len
        self.emb_dim = emb_dim
        if relative:
            # non-trainable sinusoid table
            self.pos_embedding = get_sinusoid_encoding(num_tokens=seq_len, token_len=emb_dim)
        else:
            # trainable parameter initialized to zeros (deterministic)
            self.pos_embedding = jnp.zeros((1, seq_len, emb_dim), dtype=jnp.float32)
        # Flatten (and keep f32) once at init: no per-call reshape/cast HLO.
        self._pos2 = self.pos_embedding.reshape(1, seq_len * emb_dim).astype(jnp.float32)

    def __call__(self, x: jnp.ndarray) -> jnp.ndarray:
        # TODO(synk): for best end-to-end perf this add should be fused into the
        # producing patch-embed / matmul kernel's epilogue; standalone it is HBM-bound.
        B, S, D = x.shape
        out2 = _positional_add_2d(x.reshape(B, S * D), self._pos2)
        return out2.reshape(B, S, D)


if __name__ == "__main__":
    # --- small f32 case (matches the module: batch=2, seq=8, emb_dim=32) ---
    B, S, D = 2, 8, 32
    key = jax.random.PRNGKey(0)
    x = jax.random.normal(key, (B, S, D), dtype=jnp.float32)

    module = PositionalEmbedding(seq_len=S, emb_dim=D, num_channels=4, relative=True)
    ref = np.asarray(x) + np.asarray(module.pos_embedding)
    out = jax.block_until_ready(module(x))
    np.testing.assert_allclose(np.asarray(out), ref, rtol=1e-6, atol=1e-6)

    # relative=False (trainable zeros table) path.
    module_zeros = PositionalEmbedding(seq_len=S, emb_dim=D, num_channels=4, relative=False)
    out_zeros = jax.block_until_ready(module_zeros(x))
    np.testing.assert_allclose(np.asarray(out_zeros), np.asarray(x), rtol=1e-6, atol=1e-6)

    # --- non-128-multiple F (exercises the cdiv / masked-edge lane tiling) ---
    B3, S3, D3 = 2, 8, 40   # F = 320 = 2.5 * 128
    x3 = jax.random.normal(jax.random.PRNGKey(2), (B3, S3, D3), dtype=jnp.float32)
    module3 = PositionalEmbedding(seq_len=S3, emb_dim=D3, num_channels=4, relative=True)
    ref3 = np.asarray(x3) + np.asarray(module3.pos_embedding)
    out3 = jax.block_until_ready(module3(x3))
    np.testing.assert_allclose(np.asarray(out3), ref3, rtol=1e-6, atol=1e-6)

    # --- small bf16 case (f32 accumulation in-kernel, single cast on store) ---
    B2, S2, D2 = 8, 16, 128
    x2 = jax.random.normal(jax.random.PRNGKey(1), (B2, S2, D2), dtype=jnp.bfloat16)
    module2 = PositionalEmbedding(seq_len=S2, emb_dim=D2, num_channels=4, relative=True)
    ref2 = np.asarray(
        (x2.astype(jnp.float32) + module2.pos_embedding).astype(jnp.bfloat16).astype(jnp.float32))
    out2 = jax.block_until_ready(module2(x2))
    np.testing.assert_allclose(np.asarray(out2.astype(jnp.float32)), ref2,
                               rtol=2e-2, atol=2e-2)

    print("KERNEL_OK")
</pallas_src>

<mosaic_0001>
module attributes {stable_mosaic.version = 11 : i64} {
  func.func @_add_pos_kernel(%arg0: i32, %arg1: i32, %arg2: memref<2x128xf32, #tpu.memory_space<vmem>>, %arg3: memref<1x128xf32, #tpu.memory_space<vmem>>, %arg4: memref<2x128xf32, #tpu.memory_space<vmem>>) attributes {dimension_semantics = [#tpu.dimension_semantics<parallel>, #tpu.dimension_semantics<parallel>], iteration_bounds = array<i64: 2, 1>, scalar_prefetch = 0 : i64, scratch_operands = 0 : i64, tpu.core_type = #tpu.core_type<tc>, window_params = [{transform_indices = @transform_0, window_bounds = array<i64: 2, 128>}, {transform_indices = @transform_1, window_bounds = array<i64: 1, 128>}, {transform_indices = @transform_2, window_bounds = array<i64: 2, 128>}]} {
    %c0 = arith.constant 0 : index
    %c0_0 = arith.constant 0 : index
    %0 = vector.load %arg2[%c0, %c0_0] : memref<2x128xf32, #tpu.memory_space<vmem>>, vector<2x128xf32>
    %c0_1 = arith.constant 0 : index
    %c0_2 = arith.constant 0 : index
    %1 = vector.load %arg3[%c0_1, %c0_2] : memref<1x128xf32, #tpu.memory_space<vmem>>, vector<1x128xf32>
    %2 = vector.broadcast %1 : vector<1x128xf32> to vector<2x128xf32>
    %3 = arith.addf %0, %2 : vector<2x128xf32>
    %c0_3 = arith.constant 0 : index
    %c0_4 = arith.constant 0 : index
    %4 = vector.load %arg4[%c0_3, %c0_4] : memref<2x128xf32, #tpu.memory_space<vmem>>, vector<2x128xf32>
    tpu.vector_store %arg4[%c0_3, %c0_4], %3 {strides = array<i32>} : memref<2x128xf32, #tpu.memory_space<vmem>>, vector<2x128xf32>,
    return
  }
  func.func @transform_0(%arg0: i32, %arg1: i32) -> (i32, i32) {
    %c0_i32 = arith.constant 0 : i32
    return %arg1, %arg0 : i32, i32
  }
  func.func @transform_1(%arg0: i32, %arg1: i32) -> (i32, i32) {
    %c0_i32 = arith.constant 0 : i32
    %c0_i32_0 = arith.constant 0 : i32
    return %c0_i32, %arg0 : i32, i32
  }
  func.func @transform_2(%arg0: i32, %arg1: i32) -> (i32, i32) {
    %c0_i32 = arith.constant 0 : i32
    return %arg1, %arg0 : i32, i32
  }
}

</mosaic_0001>

<bundles_post_ra>
// kernel: tpu_custom_call.1
= control target key start
LH: loop header
LB: loop body
LE: loop exit
PB: predicated region body
PF: predicated region fallthrough
CT: control target
= control target key end

     0   :  { %7 = vsyncpa [#allocation3], 0  ;;  %s692_s0 = inlined_call_operand.hbm [shape: f32[2,256], index: 0, kind: input, shape index: {}]   ;;  %s693_s1 = inlined_call_operand.vmem [shape: f32[1,256], index: 1, kind: input, shape index: {}]   ;;  %s694_s2 = inlined_call_operand.hbm [shape: f32[2,256], index: 2, kind: output, shape index: {}]  }
   0x1   :  { %9 = vsyncpa [#allocation3 + $0x1], 0 }
   0x2   :  { %10 = vsyncpa [#allocation4], 0 }
   0x3   :  { %12 = vsyncpa [#allocation4 + $0x1], 0  ;;  %s515_s9 = smov 0   ;;  %s517_s10 = smov 0  }
   0x4   :  { %s519_s11 = smov 0   ;;  %s521_s12 = smov 0  }
   0x5   :  { %s523_s13 = smov 0   ;;  %s525_s14 = smov 0  }
   0x6 LB: > { %s308_s15 = sadd.s32 4294967295, %s496_s14   ;;  %s309_s16 = sadd.s32 4294967294, %s496_s14   ;;  %s496_s14 = sphi %s525_s14, %s18_s14   ;;  %s492_s13 = sphi %s523_s13, %s710_s13   ;;  %s488_s12 = sphi %s521_s12, %s709_s12   ;;  %s484_s11 = sphi %s519_s11, %s708_s11   ;;  %s480_s10 = sphi %s517_s10, %s707_s10   ;;  %s476_s9 = sphi %s515_s9, %s706_s9  }
   0x7   : > { %s30_s17 = sadd.s32 1, %s492_s13  ;;  %s39_s18 = sadd.s32 1, %s484_s11 }
   0x8   : > { %p32_p0 = scmp.ge.s32.totalorder %s30_s17, 2  ;;  %p46_p1 = scmp.ne.s32.totalorder %s484_s11, %s480_s10 }
   0x9   : > { %p47_p2 = scmp.eq.s32.totalorder %s496_s14, 0  ;;  %p52_p3 = scmp.ne.s32.totalorder %s480_s10, %s476_s9 }
   0xa   : > { %s712_s17 = smov (%p32_p0, %s30_s17), 0  ;;  %p53_p5 = scmp.eq.s32.totalorder %s308_s15, 0 }
   0xb   : > { %p556_p4 = por %p47_p2, %p46_p1  ;;  %s35_s20 = ssub.s32 %s492_s13, %s712_s17 }
   0xc   : > { %p104_p6 = scmp.eq.s32.totalorder %s308_s15, 1  ;;  %p37_p7 = scmp.eq.s32.totalorder %s35_s20, 0 }
   0xd   : > { %p562_p8 = por %p53_p5, %p52_p3  ;;  %p110_p10 = scmp.eq.s32.totalorder %s309_s16, 1 }
   0xe   : > { %p566_p9 = por %p104_p6, %p46_p1  ;;  %p334_p13 = scmp.lt.s32.totalorder %s496_s14, 2 }
   0xf   : > { %s571_s23 = scalar_select %p37_p7, %s484_s11, %s39_s18  }
  0x10   : > { %s698_s22 = scalar_select %p566_p9, 1, 0 }
  0x11   : > { %p573_p11 = por %p110_p10, %p52_p3  ;;  %s130_s25 = sand.u32 1, %s484_s11  }
  0x12   : > { %s312_s26 = sshll.u32 %s130_s25, 1  ;;  %s313_s27 = sshll.u32 %s492_s13, 5 }
  0x13   : > { %s699_s24 = scalar_select %p573_p11, 1, 0 }
  0x14   : > { %s584_s30 = scalar_lea.hbm %s692_s0, %s313_s27  ;;  %s134_s3 = scalar_lea.vmem [#allocation2], %s312_s26 }
  0x15   : > { %s143_s4 = sshll.u32 %s134_s3, 4  ;;  %p590_p0 = pnand %p334_p13, %p556_p4  ;;  %s586_s4 = int_to_ptr.vmem [resolvable:$true] %s143_s4 }
  0x16   : > { %s131_s6 = scalar_lea.sflag [#allocation3], %s130_s25  ;;  %s384_s7 = scalar_lea.hbm %s584_s30, 32 }
  0x17   : > { %p385_p3 = scmp.ne.s32.totalorder %s584_s30, %s384_s7  ;;  %p386_p5 = pneg %p590_p0 }
  0x18   : > { %s389_s16 = scalar_lea.hbm %s692_s0, 64  ;;  %p390_p4 = scmp.lt.u32.totalorder %s584_s30, %s692_s0 }
  0x19   : > { %p387_p6 = pnand %p386_p5, %p385_p3  ;;  %p391_p10 = scmp.lt.u32.totalorder %s389_s16, %s384_s7 }
  0x1a   : > { %p393_p12 = scmp.lt.u32.totalorder %s384_s7, %s584_s30 }
  0x1b   : > { %p388_p7 = pneg %p387_p6  ;;  %p392_p13 = por %p391_p10, %p390_p4 }
  0x1d   : > { %p394_p1 = por %p393_p12, %p392_p13 }
  0x1f   : > { %p395_p2 = pnand %p394_p1, %p388_p7 }
  0x21   : > { %398 = shalt.err (!%p395_p2)
}
  0x22   : > { %s399_s20 = scalar_lea.vmem %s586_s4, 32  ;;  %s498_s25 = smov [#allocation2]  }
  0x23   : > { %p400_p3 = scmp.ne.s32.totalorder %s586_s4, %s399_s20  ;;  %s404_s26 = sshll.u32 %s498_s25, 4  ;;  %s405_s26 = int_to_ptr.vmem [resolvable:$false] %s404_s26 }
  0x24   : > { %s406_s27 = scalar_lea.vmem %s405_s26, 64  ;;  %p407_p9 = scmp.lt.s32.totalorder %s586_s4, %s405_s26 }
  0x25   : > { %p402_p6 = pnand %p400_p3, %p386_p5  ;;  %p408_p4 = scmp.lt.s32.totalorder %s406_s27, %s399_s20 }
  0x27   : > { %p403_p11 = pneg %p402_p6  ;;  %p409_p10 = por %p408_p4, %p407_p9 }
  0x29   : > { %p410_p12 = pnand %p409_p10, %p403_p11 }
  0x2b   : > { %413 = shalt.err (!%p410_p12)
}
  0x2c   : > { %329 = dma.hbm_to_vmem [thread:$0]  (!%p590_p0), %s584_s30, 32, %s586_s4, %s131_s6  }
  0x2d   : > { %p701_p1 = scmp.lt.s32.totalorder %s496_s14, 3  ;;  %p702_p2 = scmp.ge.s32.totalorder %s496_s14, 1 }
  0x2f   : > { %p155_p5 = pnand %p702_p2, %p701_p1 }
  0x30   : > { %s626_s28 = sand.u32 (!%p155_p5), 1, %s480_s10  }
  0x31   : > { %158 = sbr.rel (%p155_p5) target bundleno = 85 (0x55), region = 28  ;;  %s315_s29 = sshll.u32 (!%p155_p5), %s626_s28, 1 }
  0x32   : > { %s161_s3 = scalar_lea.sflag (!%p155_p5), [#allocation3], %s626_s28  ;;  %s164_s7 = scalar_lea.vmem (!%p155_p5), [#allocation2], %s315_s29 }
  0x38   : > { %467 = dma.done.wait (%p562_p8), %s161_s3, 32  }
  0x39   : > { %469 = vsyncadd (%p562_p8), %s161_s3, 4294967264  ;;  %p188_p9 = scmp.lt.s32.totalorder %s488_s12, 1  ;;  %s187_s8 = scalar_lea.vmem [#allocation5], %s315_s29  ;;  %v191_v0 = vld [vmem:[%s164_s7] sm:$0x3] }
  0x3a   : > { %s217_s15 = sshll.u32 %s187_s8, 4  ;;  %s319_s16 = sshll.u32 %s488_s12, 5  ;;  %s640_s15 = int_to_ptr.vmem [resolvable:$true] %s217_s15 }
  0x3b   : > { %s189_s30 = scalar_select %p188_p9, %s488_s12, 1 }
  0x3c   : > { %s645_s19 = scalar_lea.hbm %s694_s2, %s319_s16  ;;  %s202_s20 = scalar_lea.sflag [#allocation4], %s626_s28 }
  0x3d   : > { %s190_s6 = scalar_lea.vmem %s693_s1, %s189_s30  ;;  %s414_s25 = scalar_lea.vmem %s640_s15, 32 }
  0x3e   : > { %v317_v1 = vld [vmem:[%s190_s6] ss:$0 sm:$0xff]  ;;  %p415_p8 = scmp.ne.s32.totalorder %s640_s15, %s414_s25  ;;  %p703_p11 = scmp.ne.s32.totalorder %s698_s22, 0 }
  0x3f   : > { %v199_v2 = vadd.f32 %v317_v1, %v191_v0  ;;  %s499_s12 = smov [#allocation5]  }
  0x40   : > { %p416_p0 = pnand %p415_p8, %p703_p11  ;;  %s418_s26 = sshll.u32 %s499_s12, 4  ;;  %s419_s26 = int_to_ptr.vmem [resolvable:$false] %s418_s26 }
  0x41   : > { %200 = vst [vmem:[%s187_s8] sm:$0x3] %v199_v2  ;;  %s420_s27 = scalar_lea.vmem %s419_s26, 64  ;;  %p421_p13 = scmp.lt.s32.totalorder %s640_s15, %s419_s26 }
  0x42   : > { %p417_p7 = pneg %p416_p0  ;;  %p422_p3 = scmp.lt.s32.totalorder %s420_s27, %s414_s25 }
  0x44   : > { %p423_p6 = por %p422_p3, %p421_p13 }
  0x46   : > { %p424_p4 = pnand %p423_p6, %p417_p7 }
  0x48   : > { %427 = shalt.err (!%p424_p4)
}
  0x49   : > { %s428_s28 = scalar_lea.hbm %s645_s19, 32  ;;  %s432_s7 = scalar_lea.hbm %s694_s2, 64 }
  0x4a   : > { %p429_p10 = scmp.ne.s32.totalorder %s645_s19, %s428_s28  ;;  %p433_p2 = scmp.lt.u32.totalorder %s645_s19, %s694_s2 }
  0x4b   : > { %p434_p5 = scmp.lt.u32.totalorder %s432_s7, %s428_s28  ;;  %p436_p8 = scmp.lt.u32.totalorder %s428_s28, %s645_s19 }
  0x4c   : > { %p430_p12 = pnand %p429_p10, %p703_p11 }
  0x4d   : > { %p435_p9 = por %p434_p5, %p433_p2 }
  0x4e   : > { %p431_p1 = pneg %p430_p12 }
  0x4f   : > { %p437_p0 = por %p436_p8, %p435_p9 }
  0x51   : > { %p438_p7 = pnand %p437_p0, %p431_p1 }
  0x53   : > { %441 = shalt.err (!%p438_p7)
}
  0x54   : > { %324 = dma.vmem_to_hbm [thread:$0]  (%p703_p11), %s640_s15, 32, %s645_s19, %s202_s20  }
  0x55 PF: > { %s229_s5 = sand.u32 1, %s476_s9   ;;  %p704_p13 = scmp.ne.s32.totalorder %s699_s24, 0 }
  0x56   : > { %p705_p3 = scmp.ge.s32.totalorder %s496_s14, 2  ;;  %s230_s6 = scalar_lea.sflag [#allocation4], %s229_s5 }
  0x58   : > { %p331_p6 = pnand %p705_p3, %p704_p13 }
  0x5a   : > { %471 = dma.done.wait (!%p331_p6), %s230_s6, 32  }
  0x5b   : > { %473 = vsyncadd (!%p331_p6), %s230_s6, 4294967264  ;;  %s18_s14 = sadd.s32 1, %s496_s14   ;;  %s706_s9 = smov %s480_s10 }
  0x5c   : > { %p15_p4 = scmp.ge.s32.totalorder %s18_s14, 4   ;;  %s707_s10 = smov %s484_s11 }
  0x5d   : > { %s708_s11 = smov %s571_s23  ;;  %s709_s12 = smov %s492_s13 }
  0x5e   : > { %s710_s13 = smov %s712_s17  ;;  %17 = sbr.rel (!%p15_p4) target bundleno = 6 (0x6), region = 76 }
  0x65   :  { %235 = vsyncpa [#allocation3], 1 }
  0x66   :  { %237 = vsyncpa [#allocation3 + $0x1], 1 }
  0x67   :  { %238 = vsyncpa [#allocation4], 1 }
  0x68   :  { %240 = vsyncpa [#allocation4 + $0x1], 1 }

</bundles_post_ra>
